<compile_context>
chip_gen: v6e
topology: v6e:2x2x1
jax: 0.10.0
libtpu: 0.0.40
codegen_flags: <defaults>
</compile_context>

<pallas_src>
import jax
import jax.numpy as jnp
from jax.experimental import pallas as pl
from jax.experimental.pallas import tpu as pltpu

K_IN = 784   # fc1 in
H1 = 128     # fc1 out
H2 = 64      # fc2 out
N_OUT = 10   # fc3 out


def simple_nn_kernel(x_ref, w1_ref, b1_ref, w2_ref, b2_ref, w3_ref, b3_ref, o_ref):
    # fc1 + relu  (bf16 MXU inputs, f32 accumulate; x cast happens here, in VMEM)
    x = x_ref[...].astype(jnp.bfloat16)
    h1 = jnp.dot(x, w1_ref[...], preferred_element_type=jnp.float32)
    h1 = jnp.maximum(h1 + b1_ref[...], 0.0)
    # fc2 + relu
    h2 = jnp.dot(h1.astype(jnp.bfloat16), w2_ref[...],
                 preferred_element_type=jnp.float32)
    h2 = jnp.maximum(h2 + b2_ref[...], 0.0)
    # fc3
    logits = jnp.dot(h2.astype(jnp.bfloat16), w3_ref[...],
                     preferred_element_type=jnp.float32)
    logits = logits + b3_ref[...]
    # softmax over the real 10 logits, numerically stable, EXACT normalization
    m = jnp.max(logits, axis=-1, keepdims=True)
    e = jnp.exp(logits - m)
    denom = jnp.sum(e, axis=-1, keepdims=True)
    o_ref[...] = (e / denom).astype(o_ref.dtype)


def _round_up(n, m):
    return ((n + m - 1) // m) * m


def prepare_params(params):
    """One-time weight prep (call at init, reuse across forwards):
    weights -> bf16, biases -> f32 (1, out). Torch Linear layout already
    transposed to [in, out] so each layer is x @ W + b."""
    w1, b1, w2, b2, w3, b3 = params
    return (w1.astype(jnp.bfloat16), b1.astype(jnp.float32),
            w2.astype(jnp.bfloat16), b2.astype(jnp.float32),
            w3.astype(jnp.bfloat16), b3.astype(jnp.float32))


def simple_nn_forward(x, kernel_params, *, tile_b=1024):
    """x: (B, 784) f32; kernel_params: output of prepare_params.
    Returns (B, 10) f32 softmax probabilities."""
    w1, b1, w2, b2, w3, b3 = kernel_params
    B = x.shape[0]

    # Batch tile: multiple of 16 (bf16 sublane packing), capped by tile_b, and capped
    # at ceil(B/2) so the "parallel" batch grid has >= 2 steps (keeps both v7x
    # TensorCores busy; harmless on single-TC v5e/v6e).
    tb = min(tile_b, _round_up(B, 16))
    if B >= 32:
        tb = min(tb, _round_up(pl.cdiv(B, 2), 16))
    b_pad = _round_up(B, tb)

    if b_pad != B:
        # Pad only the batch axis (last ragged tile). Padded rows are sliced off below.
        x = jnp.pad(x, ((0, b_pad - B), (0, 0)))

    grid = (b_pad // tb,)
    const = lambda i: (0, 0)  # weights/biases: resident in VMEM, DMA'd once

    out = pl.pallas_call(
        simple_nn_kernel,
        out_shape=jax.ShapeDtypeStruct((b_pad, N_OUT), jnp.float32),
        grid=grid,
        in_specs=[
            pl.BlockSpec((tb, K_IN), lambda i: (i, 0)),   # x tile (streamed, f32)
            pl.BlockSpec((K_IN, H1), const),              # w1 (784, 128) bf16
            pl.BlockSpec((1, H1), const),                 # b1 (1, 128)  f32
            pl.BlockSpec((H1, H2), const),                # w2 (128, 64) bf16
            pl.BlockSpec((1, H2), const),                 # b2 (1, 64)   f32
            pl.BlockSpec((H2, N_OUT), const),             # w3 (64, 10)  bf16
            pl.BlockSpec((1, N_OUT), const),              # b3 (1, 10)   f32
        ],
        out_specs=pl.BlockSpec((tb, N_OUT), lambda i: (i, 0)),
        compiler_params=pltpu.CompilerParams(
            dimension_semantics=("parallel",),
            vmem_limit_bytes=32 << 20,
        ),
    )(x, w1, b1, w2, b2, w3, b3)

    return out if b_pad == B else out[:B]


def init_params(key):
    # nn.Linear default init: U(-1/sqrt(fan_in), +1/sqrt(fan_in)); weights stored
    # as [in, out] so each layer is x @ W + b.
    def linear(key, fan_in, fan_out):
        kw, kb = jax.random.split(key)
        bound = 1.0 / jnp.sqrt(fan_in)
        w = jax.random.uniform(kw, (fan_in, fan_out), jnp.float32, -bound, bound)
        b = jax.random.uniform(kb, (1, fan_out), jnp.float32, -bound, bound)
        return w, b

    k1, k2, k3 = jax.random.split(key, 3)
    w1, b1 = linear(k1, K_IN, H1)
    w2, b2 = linear(k2, H1, H2)
    w3, b3 = linear(k3, H2, N_OUT)
    return (w1, b1, w2, b2, w3, b3)


def _reference(x, params):
    w1, b1, w2, b2, w3, b3 = params
    h1 = jnp.maximum(x @ w1 + b1, 0.0)
    h2 = jnp.maximum(h1 @ w2 + b2, 0.0)
    return jax.nn.softmax(h2 @ w3 + b3, axis=1)


if __name__ == "__main__":
    key = jax.random.PRNGKey(0)
    k_params, k_x = jax.random.split(key)
    params = init_params(k_params)
    kernel_params = prepare_params(params)   # one-time bf16 cast, reused per forward

    # Small deterministic test batch; tile_b=16 exercises a 3-step batch grid.
    # For production batches, keep the default tile_b=1024.
    B = 48
    x = jax.random.normal(k_x, (B, 784), dtype=jnp.float32)

    out = simple_nn_forward(x, kernel_params, tile_b=16)
    out = jax.block_until_ready(out)

    # sanity: shape, softmax rows sum to 1 (exact normalization), close to f32 ref
    assert out.shape == (B, N_OUT)
    assert jnp.allclose(jnp.sum(out, axis=1), 1.0, atol=1e-5), \
        float(jnp.max(jnp.abs(jnp.sum(out, axis=1) - 1.0)))
    ref = _reference(x, params)
    # bf16 MXU matmuls -> loose tolerance vs the pure-f32 reference
    assert jnp.allclose(out, ref, atol=3e-2), float(jnp.max(jnp.abs(out - ref)))

    print("KERNEL_OK")
</pallas_src>

<mosaic_0001>
module attributes {stable_mosaic.version = 11 : i64} {
  func.func @simple_nn_kernel(%arg0: i32, %arg1: memref<16x784xf32, #tpu.memory_space<vmem>>, %arg2: memref<784x128xbf16, #tpu.memory_space<vmem>>, %arg3: memref<1x128xf32, #tpu.memory_space<vmem>>, %arg4: memref<128x64xbf16, #tpu.memory_space<vmem>>, %arg5: memref<1x64xf32, #tpu.memory_space<vmem>>, %arg6: memref<64x10xbf16, #tpu.memory_space<vmem>>, %arg7: memref<1x10xf32, #tpu.memory_space<vmem>>, %arg8: memref<16x10xf32, #tpu.memory_space<vmem>>) attributes {dimension_semantics = [#tpu.dimension_semantics<parallel>], iteration_bounds = array<i64: 3>, scalar_prefetch = 0 : i64, scratch_operands = 0 : i64, tpu.core_type = #tpu.core_type<tc>, window_params = [{transform_indices = @transform_0, window_bounds = array<i64: 16, 784>}, {pipeline_mode = #tpu.pipeline_mode<synchronous>, transform_indices = @transform_1, window_bounds = array<i64: 784, 128>}, {pipeline_mode = #tpu.pipeline_mode<synchronous>, transform_indices = @transform_2, window_bounds = array<i64: 1, 128>}, {pipeline_mode = #tpu.pipeline_mode<synchronous>, transform_indices = @transform_3, window_bounds = array<i64: 128, 64>}, {pipeline_mode = #tpu.pipeline_mode<synchronous>, transform_indices = @transform_4, window_bounds = array<i64: 1, 64>}, {pipeline_mode = #tpu.pipeline_mode<synchronous>, transform_indices = @transform_5, window_bounds = array<i64: 64, 10>}, {pipeline_mode = #tpu.pipeline_mode<synchronous>, transform_indices = @transform_6, window_bounds = array<i64: 1, 10>}, {transform_indices = @transform_7, window_bounds = array<i64: 16, 10>}]} {
    %c0 = arith.constant 0 : index
    %c0_0 = arith.constant 0 : index
    %0 = vector.load %arg1[%c0, %c0_0] : memref<16x784xf32, #tpu.memory_space<vmem>>, vector<16x784xf32>
    %1 = arith.truncf %0 : vector<16x784xf32> to vector<16x784xbf16>
    %c0_1 = arith.constant 0 : index
    %c0_2 = arith.constant 0 : index
    %2 = vector.load %arg2[%c0_1, %c0_2] : memref<784x128xbf16, #tpu.memory_space<vmem>>, vector<784x128xbf16>
    %cst = arith.constant dense<0.000000e+00> : vector<16x128xf32>
    %3 = tpu.matmul %1, %2, %cst {dimension_numbers = #tpu.dot_dimension_numbers<[1], [0], [0], [1], [0, 0, 1, 1], [], []>} : vector<16x784xbf16>, vector<784x128xbf16>, vector<16x128xf32> -> vector<16x128xf32>
    %c0_3 = arith.constant 0 : index
    %c0_4 = arith.constant 0 : index
    %4 = vector.load %arg3[%c0_3, %c0_4] : memref<1x128xf32, #tpu.memory_space<vmem>>, vector<1x128xf32>
    %5 = vector.broadcast %4 : vector<1x128xf32> to vector<16x128xf32>
    %6 = arith.addf %3, %5 : vector<16x128xf32>
    %cst_5 = arith.constant 0.000000e+00 : f32
    %7 = vector.broadcast %cst_5 : f32 to vector<16x128xf32>
    %8 = arith.maximumf %6, %7 : vector<16x128xf32>
    %9 = arith.truncf %8 : vector<16x128xf32> to vector<16x128xbf16>
    %c0_6 = arith.constant 0 : index
    %c0_7 = arith.constant 0 : index
    %10 = vector.load %arg4[%c0_6, %c0_7] : memref<128x64xbf16, #tpu.memory_space<vmem>>, vector<128x64xbf16>
    %cst_8 = arith.constant dense<0.000000e+00> : vector<16x64xf32>
    %11 = tpu.matmul %9, %10, %cst_8 {dimension_numbers = #tpu.dot_dimension_numbers<[1], [0], [0], [1], [0, 0, 1, 1], [], []>} : vector<16x128xbf16>, vector<128x64xbf16>, vector<16x64xf32> -> vector<16x64xf32>
    %c0_9 = arith.constant 0 : index
    %c0_10 = arith.constant 0 : index
    %12 = vector.load %arg5[%c0_9, %c0_10] : memref<1x64xf32, #tpu.memory_space<vmem>>, vector<1x64xf32>
    %13 = vector.broadcast %12 : vector<1x64xf32> to vector<16x64xf32>
    %14 = arith.addf %11, %13 : vector<16x64xf32>
    %cst_11 = arith.constant 0.000000e+00 : f32
    %15 = vector.broadcast %cst_11 : f32 to vector<16x64xf32>
    %16 = arith.maximumf %14, %15 : vector<16x64xf32>
    %17 = arith.truncf %16 : vector<16x64xf32> to vector<16x64xbf16>
    %c0_12 = arith.constant 0 : index
    %c0_13 = arith.constant 0 : index
    %18 = vector.load %arg6[%c0_12, %c0_13] : memref<64x10xbf16, #tpu.memory_space<vmem>>, vector<64x10xbf16>
    %cst_14 = arith.constant dense<0.000000e+00> : vector<16x10xf32>
    %19 = tpu.matmul %17, %18, %cst_14 {dimension_numbers = #tpu.dot_dimension_numbers<[1], [0], [0], [1], [0, 0, 1, 1], [], []>} : vector<16x64xbf16>, vector<64x10xbf16>, vector<16x10xf32> -> vector<16x10xf32>
    %c0_15 = arith.constant 0 : index
    %c0_16 = arith.constant 0 : index
    %20 = vector.load %arg7[%c0_15, %c0_16] : memref<1x10xf32, #tpu.memory_space<vmem>>, vector<1x10xf32>
    %21 = vector.broadcast %20 : vector<1x10xf32> to vector<16x10xf32>
    %22 = arith.addf %19, %21 : vector<16x10xf32>
    %cst_17 = arith.constant dense<0xFF800000> : vector<16xf32>
    %23 = vector.multi_reduction <maximumf>, %22, %cst_17 [1] : vector<16x10xf32> to vector<16xf32>
    %24 = vector.shape_cast %23 : vector<16xf32> to vector<16x1xf32>
    %25 = vector.broadcast %24 : vector<16x1xf32> to vector<16x10xf32>
    %26 = arith.subf %22, %25 : vector<16x10xf32>
    %27 = math.exp %26 : vector<16x10xf32>
    %cst_18 = arith.constant dense<0.000000e+00> : vector<16xf32>
    %28 = vector.multi_reduction <add>, %27, %cst_18 [1] : vector<16x10xf32> to vector<16xf32>
    %29 = vector.shape_cast %28 : vector<16xf32> to vector<16x1xf32>
    %30 = vector.broadcast %29 : vector<16x1xf32> to vector<16x10xf32>
    %31 = arith.divf %27, %30 : vector<16x10xf32>
    %c0_19 = arith.constant 0 : index
    %c0_20 = arith.constant 0 : index
    %32 = vector.load %arg8[%c0_19, %c0_20] : memref<16x10xf32, #tpu.memory_space<vmem>>, vector<16x10xf32>
    tpu.vector_store %arg8[%c0_19, %c0_20], %31 {strides = array<i32>} : memref<16x10xf32, #tpu.memory_space<vmem>>, vector<16x10xf32>,
    return
  }
  func.func @transform_0(%arg0: i32) -> (i32, i32) {
    %c0_i32 = arith.constant 0 : i32
    %c0_i32_0 = arith.constant 0 : i32
    return %arg0, %c0_i32 : i32, i32
  }
  func.func @transform_1(%arg0: i32) -> (i32, i32) {
    %c0_i32 = arith.constant 0 : i32
    %c0_i32_0 = arith.constant 0 : i32
    %c0_i32_1 = arith.constant 0 : i32
    return %c0_i32, %c0_i32_0 : i32, i32
  }
  func.func @transform_2(%arg0: i32) -> (i32, i32) {
    %c0_i32 = arith.constant 0 : i32
    %c0_i32_0 = arith.constant 0 : i32
    %c0_i32_1 = arith.constant 0 : i32
    return %c0_i32, %c0_i32_0 : i32, i32
  }
  func.func @transform_3(%arg0: i32) -> (i32, i32) {
    %c0_i32 = arith.constant 0 : i32
    %c0_i32_0 = arith.constant 0 : i32
    %c0_i32_1 = arith.constant 0 : i32
    return %c0_i32, %c0_i32_0 : i32, i32
  }
  func.func @transform_4(%arg0: i32) -> (i32, i32) {
    %c0_i32 = arith.constant 0 : i32
    %c0_i32_0 = arith.constant 0 : i32
    %c0_i32_1 = arith.constant 0 : i32
    return %c0_i32, %c0_i32_0 : i32, i32
  }
  func.func @transform_5(%arg0: i32) -> (i32, i32) {
    %c0_i32 = arith.constant 0 : i32
    %c0_i32_0 = arith.constant 0 : i32
    %c0_i32_1 = arith.constant 0 : i32
    return %c0_i32, %c0_i32_0 : i32, i32
  }
  func.func @transform_6(%arg0: i32) -> (i32, i32) {
    %c0_i32 = arith.constant 0 : i32
    %c0_i32_0 = arith.constant 0 : i32
    %c0_i32_1 = arith.constant 0 : i32
    return %c0_i32, %c0_i32_0 : i32, i32
  }
  func.func @transform_7(%arg0: i32) -> (i32, i32) {
    %c0_i32 = arith.constant 0 : i32
    %c0_i32_0 = arith.constant 0 : i32
    return %arg0, %c0_i32 : i32, i32
  }
}

</mosaic_0001>

<bundles_post_ra>
// kernel: tpu_custom_call.1
= control target key start
LH: loop header
LB: loop body
LE: loop exit
PB: predicated region body
PF: predicated region fallthrough
CT: control target
= control target key end

     0   :  { %12 = vsyncpa [#allocation3], 0  ;;  %s1895_s0 = inlined_call_operand.hbm [shape: f32[48,784], index: 0, kind: input, shape index: {}]   ;;  %s1896_s1 = inlined_call_operand.hbm [shape: bf16[784,128], index: 1, kind: input, shape index: {}]   ;;  %s1897_s2 = inlined_call_operand.vmem [shape: f32[1,128], index: 2, kind: input, shape index: {}]   ;;  %s1898_s3 = inlined_call_operand.vmem [shape: bf16[128,64], index: 3, kind: input, shape index: {}]   ;;  %s1899_s4 = inlined_call_operand.vmem [shape: f32[1,64], index: 4, kind: input, shape index: {}]   ;;  %s1900_s5 = inlined_call_operand.vmem [shape: bf16[64,10], index: 5, kind: input, shape index: {}]   ;;  %s1901_s6 = inlined_call_operand.vmem [shape: f32[1,10], index: 6, kind: input, shape index: {}]   ;;  %s1902_s7 = inlined_call_operand.vmem [shape: f32[48,10], index: 7, kind: output, shape index: {}]  }
   0x1   :  { %14 = vsyncpa [#allocation3 + $0x1], 0 }
   0x2   :  { %15 = vsyncpa [#allocation5], 0  ;;  %s1680_s24 = smov 0   ;;  %s1682_s25 = smov 0  }
   0x3   :  { %s1684_s26 = smov 0   ;;  %s1686_s27 = smov 0  }
   0x4 LB: > { %s1210_s28 = sadd.s32 4294967295, %s1630_s27   ;;  %p41_p0 = scmp.ne.s32.totalorder %s1622_s25, %s1618_s24  ;;  %s1630_s27 = sphi %s1686_s27, %s1918_s27   ;;  %s1626_s26 = sphi %s1684_s26, %s1917_s26   ;;  %s1622_s25 = sphi %s1682_s25, %s1916_s25   ;;  %s1618_s24 = sphi %s1680_s24, %s1915_s24  }
   0x5   : > { %p1702_p1 = scmp.eq.s32.totalorder %s1210_s28, 0  ;;  %p1212_p2 = scmp.ge.s32.totalorder %s1630_s27, 1 }
   0x6   : > { %p204_p3 = scmp.lt.s32.totalorder %s1630_s27, 4  ;;  %s1632_s9 = smov [#allocation4]  }
   0x7   : > { %s1907_s29 = scalar_select %p1702_p1, 1, 0 }
   0x8   : > { %p1710_p4 = por %p1702_p1, %p41_p0  ;;  %p1714_p5 = pnand %p1212_p2, %p204_p3 }
   0x9   : > { %s216_s10 = sshll.u32 %s1632_s9, 4  ;;  %s1727_s12 = sadd.s32 1, %s1630_s27   ;;  %s217_s10 = int_to_ptr.vmem [resolvable:$true] %s216_s10 }
   0xa   : > { %s1908_s30 = scalar_select %p1710_p4, 1, 0 }
   0xb   : > { %s1909_s8 = scalar_select %p1714_p5, 1, 0 }
   0xc   : > { %p1419_p6 = pneg %p1714_p5  ;;  %s28_s13 = sadd.s32 1, %s1626_s26 }
   0xd   : > { %s25_s14 = ssub.s32 %s1630_s27, %s1727_s12  ;;  %s1549_s15 = scalar_lea.vmem %s217_s10, 6272 }
   0xe   : > { %p1722_p7 = pnand %p1419_p6, %p1702_p1  ;;  %p1550_p9 = scmp.ne.s32.totalorder %s217_s10, %s1549_s15 }
   0xf   : > { %p1557_p12 = scmp.lt.s32.totalorder %s217_s10, %s217_s10  ;;  %p1558_p13 = scmp.lt.s32.totalorder %s1549_s15, %s1549_s15 }
  0x10   : > { %p1540_p8 = pneg %p1722_p7 }
  0x11   : > { %p1559_p0 = por %p1558_p13, %p1557_p12 }
  0x12   : > { %p1552_p10 = pnand %p1550_p9, %p1540_p8 }
  0x14   : > { %p1553_p11 = pneg %p1552_p10 }
  0x16   : > { %p1560_p2 = pnand %p1559_p0, %p1553_p11 }
  0x18   : > { %1563 = shalt.err (!%p1560_p2)
}
  0x19   : > { %s1633_s16 = smov 64   ;;  %s1634_s17 = smov 4  }
  0x1a   : > { %1422 = dma.hbm_to_vmem [thread:$0]  (!%p1722_p7), %s1896_s1, 6272, %s217_s10, [#allocation5], %s1633_s16, %s1633_s16, %s1634_s17  }
  0x1b   : > { %p26_p3 = scmp.eq.s32.totalorder %s25_s14, 0  ;;  %p35_p6 = scmp.ne.s32.totalorder %s1626_s26, %s1622_s25 }
  0x1c   : > { %p36_p8 = scmp.eq.s32.totalorder %s1630_s27, 0  ;;  %p1428_p9 = scmp.lt.s32.totalorder %s1630_s27, 3 }
  0x1d   : > { %s1744_s20 = scalar_select %p26_p3, %s1626_s26, %s28_s13  }
  0x1e   : > { %p37_p10 = por %p36_p8, %p35_p6  ;;  %s245_s21 = sand.u32 1, %s1626_s26  }
  0x1f   : > { %s1410_s22 = smul.u32 112, %s245_s21  ;;  %s1759_s14 = scalar_lea.sflag [#allocation3], %s245_s21 }
  0x20   : > { %s1411_s23 = smul.u32 1792, %s1630_s27  ;;  %p1748_p11 = pnand %p1428_p9, %p37_p10 }
  0x21   : > { %s249_s10 = scalar_lea.vmem [#allocation2], %s1410_s22  ;;  %s1569_s19 = scalar_lea.hbm %s1895_s0, 5376 }
  0x22   : > { %s1755_s15 = scalar_lea.hbm %s1895_s0, %s1411_s23  ;;  %s257_s13 = sshll.u32 %s249_s10, 4  ;;  %s1757_s13 = int_to_ptr.vmem [resolvable:$true] %s257_s13 }
  0x23   : > { %s1564_s16 = scalar_lea.hbm %s1755_s15, 1792  ;;  %p1566_p12 = pneg %p1748_p11 }
  0x24   : > { %p1565_p7 = scmp.ne.s32.totalorder %s1755_s15, %s1564_s16  ;;  %p1570_p2 = scmp.lt.s32.totalorder %s1755_s15, %s1895_s0 }
  0x25   : > { %p1571_p3 = scmp.lt.s32.totalorder %s1569_s19, %s1564_s16 }
  0x26   : > { %p1567_p13 = pnand %p1566_p12, %p1565_p7 }
  0x27   : > { %p1572_p6 = por %p1571_p3, %p1570_p2 }
  0x28   : > { %p1568_p0 = pneg %p1567_p13 }
  0x2a   : > { %p1573_p8 = pnand %p1572_p6, %p1568_p0 }
  0x2c   : > { %1576 = shalt.err (!%p1573_p8)
}
  0x2d   : > { %s1577_s21 = scalar_lea.vmem %s1757_s13, 1792  ;;  %s1635_s22 = smov [#allocation2]  }
  0x2e   : > { %p1578_p9 = scmp.ne.s32.totalorder %s1757_s13, %s1577_s21  ;;  %s1582_s11 = sshll.u32 %s1635_s22, 4  ;;  %s1583_s11 = int_to_ptr.vmem [resolvable:$false] %s1582_s11 }
  0x2f   : > { %s1584_s10 = scalar_lea.vmem %s1583_s11, 3584  ;;  %p1585_p13 = scmp.lt.s32.totalorder %s1757_s13, %s1583_s11 }
  0x30   : > { %p1580_p10 = pnand %p1578_p9, %p1566_p12  ;;  %p1586_p1 = scmp.lt.s32.totalorder %s1584_s10, %s1577_s21 }
  0x32   : > { %p1581_p7 = pneg %p1580_p10  ;;  %p1587_p4 = por %p1586_p1, %p1585_p13 }
  0x34   : > { %p1588_p5 = pnand %p1587_p4, %p1581_p7 }
  0x36   : > { %1591 = shalt.err (!%p1588_p5)
}
  0x37   : > { %s1636_s16 = smov 896   ;;  %s1637_s17 = smov 56  }
  0x38   : > { %1426 = dma.hbm_to_vmem [thread:$0]  (!%p1748_p11), %s1755_s15, 1792, %s1757_s13, %s1759_s14, %s1636_s16, %s1636_s16, %s1637_s17  }
  0x39   : > { %p1912_p12 = scmp.ne.s32.totalorder %s1909_s8, 0 }
  0x3a   : > { %s271_s18 = sand.u32 (!%p1912_p12), 1, %s1622_s25   ;;  %p1913_p1 = scmp.ne.s32.totalorder (!%p1912_p12), %s1908_s30, 0 }
  0x3b   : > { %269 = sbr.rel (%p1912_p12) target bundleno = 1057 (0x421), region = 48  ;;  %s272_s23 = scalar_lea.sflag (!%p1912_p12), [#allocation3], %s271_s18 }
  0x3c   : > { %s1412_s19 = smul.u32 (!%p1912_p12), 112, %s271_s18 }
  0x3e   : > { %s1783_s9 = scalar_lea.vmem (!%p1912_p12), [#allocation2], %s1412_s19 }
  0x40   : > { %1609 = dma.done.wait (%p1913_p1), %s272_s23, 1792  }
  0x41   : > { %1611 = vsyncadd (%p1913_p1), %s272_s23, 4294965504  ;;  %p1914_p4 = scmp.ne.s32.totalorder %s1907_s29, 0 }
  0x43   : > { %1613 = dma.done.wait (%p1914_p4), [#allocation5], 6272  }
  0x44   : > { %1615 = vsyncadd (%p1914_p4), [#allocation5], 4294961024  ;;  %v1469_v0 = vld [vmem:[#allocation4 + $0x78] sm:$0xff]   ;;  %v1473_v4 = vld [vmem:[#allocation4 + $0x70] sm:$0xff]   ;;  %v1638_v43 = vmov 0.0   ;;  %vm1639_vm0 = vmmov 0  }
  0x45   : > { %v1470_v1 = vld [vmem:[#allocation4 + $0x38] sm:$0xff]   ;;  %1290 = vmatprep.subr.bf16.mxu0 %v1469_v0  ;;  %v1474_v5 = vld [vmem:[#allocation4 + $0x30] sm:$0xff]   ;;  %v1477_v8 = vld [vmem:[#allocation4 + $0x68] sm:$0xff]   ;;  %vm738_vm1 = vcmask 130048   ;;  %vm1063_vm2 = vcmask 523264   ;;  %vm1108_vm3 = vcmask 80896  }
  0x46   : > { %v1471_v2 = vld [vmem:[#allocation4 + $0xf8] sm:$0xff]   ;;  %1291 = vmatpush3.bf16.msra.mxu0 %v1470_v1  ;;  %v1475_v6 = vld [vmem:[#allocation4 + $0xf0] sm:$0xff]   ;;  %v1478_v9 = vld [vmem:[#allocation4 + $0x28] sm:$0xff]   ;;  %s1220_s18 = sshll.u32 %s1210_s28, 1 }
  0x47   : > { %v1472_v3 = vld [vmem:[#allocation4 + $0xb8] sm:$0xff]   ;;  %1312 = vmatprep.subr.bf16.mxu1 %v1471_v2  ;;  %1292 = vmatprep.subr.bf16.mxu0 %v1473_v4  ;;  %v1476_v7 = vld [vmem:[#allocation4 + $0xb0] sm:$0xff]   ;;  %v1479_v10 = vld [vmem:[#allocation4 + $0xe8] sm:$0xff]   ;;  %p312_p5 = scmp.lt.s32.totalorder %s1220_s18, 5 }
  0x48   : > { %1313 = vmatpush3.bf16.msra.mxu1 %v1472_v3  ;;  %v1480_v11 = vld [vmem:[#allocation4 + $0xa8] sm:$0xff]   ;;  %v1481_v12 = vld [vmem:[#allocation4 + $0x60] sm:$0xff]   ;;  %v1485_v16 = vld [vmem:[#allocation4 + $0x58] sm:$0xff]  }
  0x49   : > { %1314 = vmatprep.subr.bf16.mxu1 %v1475_v6  ;;  %v1482_v13 = vld [vmem:[#allocation4 + $0x20] sm:$0xff]   ;;  %v1486_v17 = vld [vmem:[#allocation4 + $0x18] sm:$0xff]   ;;  %v1489_v20 = vld [vmem:[#allocation4 + $0x50] sm:$0xff]   ;;  %s1920_s18 = smov (!%p312_p5, %s1220_s18), 5 }
  0x4a   : > { %1293 = vmatpush3.bf16.msra.mxu0 %v1474_v5  ;;  %v1483_v14 = vld [vmem:[#allocation4 + $0xe0] sm:$0xff]   ;;  %v1487_v18 = vld [vmem:[#allocation4 + $0xd8] sm:$0xff]   ;;  %v1490_v21 = vld [vmem:[#allocation4 + $0x10] sm:$0xff]   ;;  %s1221_s19 = sshll.u32 %s1920_s18, 3 }
  0x4b   : > { %1294 = vmatprep.subr.bf16.mxu0 %v1477_v8  ;;  %v1484_v15 = vld [vmem:[#allocation4 + $0xa0] sm:$0xff]   ;;  %v1488_v19 = vld [vmem:[#allocation4 + $0x98] sm:$0xff]   ;;  %v1491_v22 = vld [vmem:[#allocation4 + $0xd0] sm:$0xff]   ;;  %s315_s29 = scalar_lea.vmem %s1902_s7, %s1221_s19 }
  0x4c   : > { %1315 = vmatpush3.bf16.msra.mxu1 %v1476_v7  ;;  %v1492_v23 = vld [vmem:[#allocation4 + $0x90] sm:$0xff]   ;;  %v1493_v24 = vld [vmem:[#allocation4 + $0x48] sm:$0xff]   ;;  %v1497_v28 = vld [vmem:[#allocation4 + $0x40] sm:$0xff]  }
  0x4d   : > { %1316 = vmatprep.subr.bf16.mxu1 %v1479_v10  ;;  %v1494_v25 = vld [vmem:[#allocation4 + $0x8] sm:$0xff]   ;;  %v1498_v29 = vld [vmem:[#allocation4] sm:$0xff]   ;;  %v1501_v38 = vld [vmem:[#allocation4 + $0x178] sm:$0xff]  }
  0x4e   : > { %1295 = vmatpush3.bf16.msra.mxu0 %v1478_v9  ;;  %v1495_v26 = vld [vmem:[#allocation4 + $0xc8] sm:$0xff]   ;;  %v1499_v30 = vld [vmem:[#allocation4 + $0xc0] sm:$0xff]   ;;  %v1502_v42 = vld [vmem:[#allocation4 + $0x138] sm:$0xff]  }
  0x4f   : > { %1296 = vmatprep.subr.bf16.mxu0 %v1481_v12  ;;  %v1496_v27 = vld [vmem:[#allocation4 + $0x88] sm:$0xff]   ;;  %v326_v32 = vld [vmem:[%s1783_s9 + $0x40] sm:$0xff]  ;;  %v328_v40 = vld [vmem:[%s1783_s9 + $0x50] sm:$0xff] }
  0x50   : > { %1317 = vmatpush3.bf16.msra.mxu1 %v1480_v11  ;;  %v319_v31 = vld [vmem:[%s1783_s9 + $0x8] sm:$0xff]  ;;  %v1500_v34 = vld [vmem:[#allocation4 + $0x80] sm:$0xff]   ;;  %v325_v36 = vld [vmem:[%s1783_s9 + $0x38] sm:$0xff] }
  0x51   : > { %1318 = vmatprep.subr.bf16.mxu1 %v1483_v14  ;;  %v333_v33 = vpack.c.bf16 %v326_v32, %v319_v31  ;;  %v318_v35 = vld [vmem:[%s1783_s9] sm:$0xff]  ;;  %v321_v39 = vld [vmem:[%s1783_s9 + $0x18] sm:$0xff]  ;;  %v320_v44 = vld [vmem:[%s1783_s9 + $0x10] sm:$0xff] }
  0x52   : > { %1297 = vmatpush3.bf16.msra.mxu0 %v1482_v13  ;;  %v332_v37 = vpack.c.bf16 %v325_v36, %v318_v35  ;;  %v335_v41 = vpack.c.bf16 %v328_v40, %v321_v39  ;;  %v327_v45 = vld [vmem:[%s1783_s9 + $0x48] sm:$0xff]  ;;  %v1503_v47 = vld [vmem:[#allocation4 + $0x170] sm:$0xff]   ;;  %v1507_v51 = vld [vmem:[#allocation4 + $0x160] sm:$0xff]  }
  0x53   : > { %1298 = vmatprep.subr.bf16.mxu0 %v1485_v16  ;;  %774 = vmatprep.mubr.bf16.mxu0 %v333_v33  ;;  %v334_v46 = vpack.c.bf16 %v327_v45, %v320_v44  ;;  %v1504_v48 = vld [vmem:[#allocation4 + $0x130] sm:$0xff]   ;;  %v1505_v49 = vld [vmem:[#allocation4 + $0x168] sm:$0xff]   ;;  %v1508_v52 = vld [vmem:[#allocation4 + $0x120] sm:$0xff]  }
  0x54   : > { %1319 = vmatpush3.bf16.msra.mxu1 %v1484_v15  ;;  %815 = vmatprep.mubr.bf16.mxu1 %v335_v41  ;;  %v1506_v50 = vld [vmem:[#allocation4 + $0x128] sm:$0xff]   ;;  %v1509_v53 = vld [vmem:[#allocation4 + $0x158] sm:$0xff]   ;;  %v1511_v55 = vld [vmem:[#allocation4 + $0x150] sm:$0xff]  }
  0x55   : > { %1320 = vmatprep.subr.bf16.mxu1 %v1487_v18  ;;  %v1510_v54 = vld [vmem:[#allocation4 + $0x118] sm:$0xff]   ;;  %v1517_v56 = vld [vmem:[#allocation4 + $0x180] sm:$0xff]   ;;  %v1512_v58 = vld [vmem:[#allocation4 + $0x110] sm:$0xff]  }
  0x56   : > { %1299 = vmatpush3.bf16.msra.mxu0 %v1486_v17  ;;  %v323_v57 = vld [vmem:[%s1783_s9 + $0x28] sm:$0xff]  ;;  %v330_v60 = vld [vmem:[%s1783_s9 + $0x60] sm:$0xff]  ;;  %v324_v62 = vld [vmem:[%s1783_s9 + $0x30] sm:$0xff] }
  0x57   : > { %1300 = vmatprep.subr.bf16.mxu0 %v1489_v20  ;;  %v1513_v59 = vld [vmem:[#allocation4 + $0x148] sm:$0xff]   ;;  %v337_v61 = vpack.c.bf16 %v330_v60, %v323_v57  ;;  %v1515_v2 = vld [vmem:[#allocation4 + $0x140] sm:$0xff]   ;;  %v1518_v7 = vld [vmem:[%s1898_s3 + $0x38] sm:$0xff]  }
  0x58   : > { %1321 = vmatpush3.bf16.msra.mxu1 %v1488_v19  ;;  %v331_v63 = vld [vmem:[%s1783_s9 + $0x68] sm:$0xff]  ;;  %v1516_v3 = vld [vmem:[#allocation4 + $0x100] sm:$0xff]   ;;  %v329_v5 = vld [vmem:[%s1783_s9 + $0x58] sm:$0xff] }
  0x59   : > { %1322 = vmatprep.subr.bf16.mxu1 %v1491_v22  ;;  %v338_v0 = vpack.c.bf16 %v331_v63, %v324_v62  ;;  %v1514_v1 = vld [vmem:[#allocation4 + $0x108] sm:$0xff]   ;;  %v322_v4 = vld [vmem:[%s1783_s9 + $0x20] sm:$0xff]  ;;  %v1522_v11 = vld [vmem:[%s1898_s3 + $0x18] sm:$0xff]  }
  0x5a   : > { %1301 = vmatpush3.bf16.msra.mxu0 %v1490_v21  ;;  %v336_v6 = vpack.c.bf16 %v329_v5, %v322_v4  ;;  %v1519_v8 = vld [vmem:[%s1898_s3 + $0x30] sm:$0xff]   ;;  %v1520_v9 = vld [vmem:[%s1898_s3 + $0x28] sm:$0xff]   ;;  %v1521_v10 = vld [vmem:[%s1898_s3 + $0x20] sm:$0xff]  }
  0x5b   : > { %1302 = vmatprep.subr.bf16.mxu0 %v1493_v24  ;;  %v1523_v12 = vld [vmem:[%s1898_s3 + $0x10] sm:$0xff]   ;;  %v1524_v13 = vld [vmem:[%s1898_s3 + $0x8] sm:$0xff]   ;;  %v1525_v14 = vld [vmem:[%s1898_s3] sm:$0xff]  }
  0x5c   : > { %1323 = vmatpush3.bf16.msra.mxu1 %v1492_v23  ;;  %v1526_v15 = vld [vmem:[%s1900_s5 + $0x18] sm:$0xff]  }
  0x5d   : > { %1324 = vmatprep.subr.bf16.mxu1 %v1495_v26 }
  0x5e   : > { %1303 = vmatpush3.bf16.msra.mxu0 %v1494_v25 }
  0x5f   : > { %1304 = vmatprep.subr.bf16.mxu0 %v1497_v28  ;;  %v1222_v28 = vld [vmem:[%s1897_s2] ss:$0 sm:$0xff] }
  0x60   : > { %1325 = vmatpush3.bf16.msra.mxu1 %v1496_v27 }
  0x61   : > { %1326 = vmatprep.subr.bf16.mxu1 %v1499_v30 }
  0x62   : > { %1305 = vmatpush3.bf16.msra.mxu0 %v1498_v29 }
  0x63   : > { %1334 = vmatprep.subr.bf16.mxu0 %v1501_v38 }
  0x64   : > { %1327 = vmatpush3.bf16.msra.mxu1 %v1500_v34 }
  0x65   : > { %1372 = vmatprep.subr.bf16.mxu1 %v1638_v43  ;;  %775 = vmatmul.mubr.bf16.vlgmr.msra.gmra.mxu0 %v332_v37 }
  0x66   : > { %1335 = vmatpush3.bf16.msra.mxu0 %v1502_v42  ;;  %856 = vmatprep.mubr.bf16.mxu0 %v337_v61 }
  0x67   : > { %816 = vmatmul.mubr.bf16.vlgmr.msra.gmra.mxu1 %v334_v46  ;;  %1336 = vmatprep.subr.bf16.mxu0 %v1503_v47 }
  0x68   : > { %1374 = vmatprep.mubr.msk.bf16.mxu1 %vm1639_vm0, %v1638_v43  ;;  %1373 = vmatpush3.bf16.msra.mxu1 %v1517_v56 }
  0x69   : > { %1378 = vmatprep.subr.bf16.mxu1 %v1638_v43 }
  0x6a   : > { %1337 = vmatpush3.bf16.msra.mxu0 %v1504_v48 }
  0x6b   : > { %1338 = vmatprep.subr.bf16.mxu0 %v1505_v49 }
  0x6e   : > { %1339 = vmatpush3.bf16.msra.mxu0 %v1506_v50 }
  0x6f   : > { %1340 = vmatprep.subr.bf16.mxu0 %v1507_v51  ;;  %1375 = vmatmul.mubr.msk.bf16.vlgmr.msra.gmra.mxu1 %vm738_vm1, %v338_v0  ;;  %v1527_v51 = vld [vmem:[%s1900_s5 + $0x10] sm:$0xff]  }
  0x70   : > { %1394 = vmatprep.mubr.msk.bf16.mxu1 %vm1639_vm0, %v1638_v43  ;;  %1379 = vmatpush3.bf16.msra.mxu1 %v1518_v7 }
  0x71   : > { %1380 = vmatprep.subr.bf16.mxu1 %v1638_v43 }
  0x72   : > { %1341 = vmatpush3.bf16.msra.mxu0 %v1508_v52  ;;  %v1528_v52 = vld [vmem:[%s1900_s5 + $0x8] sm:$0xff]  }
  0x73   : > { %1342 = vmatprep.subr.bf16.mxu0 %v1509_v53  ;;  %v1529_v53 = vld [vmem:[%s1900_s5] sm:$0xff]  }
  0x74   : > { %1381 = vmatpush3.bf16.msra.mxu1 %v1519_v8 }
  0x75   : > { %1382 = vmatprep.subr.bf16.mxu1 %v1638_v43 }
  0x76   : > { %1343 = vmatpush3.bf16.msra.mxu0 %v1510_v54  ;;  %v1273_v54 = vld [vmem:[%s1899_s4] ss:$0 sm:$0xff] }
  0x77   : > { %1344 = vmatprep.subr.bf16.mxu0 %v1511_v55 }
  0x78   : > { %1383 = vmatpush3.bf16.msra.mxu1 %v1520_v9 }
  0x79   : > { %1384 = vmatprep.subr.bf16.mxu1 %v1638_v43 }
  0x7a   : > { %1345 = vmatpush3.bf16.msra.mxu0 %v1512_v58 }
  0x7b   : > { %1346 = vmatprep.subr.bf16.mxu0 %v1513_v59 }
  0x7c   : > { %1385 = vmatpush3.bf16.msra.mxu1 %v1521_v10 }
  0x7d   : > { %1386 = vmatprep.subr.bf16.mxu1 %v1638_v43 }
  0x7e   : > { %1347 = vmatpush3.bf16.msra.mxu0 %v1514_v1 }
  0x7f   : > { %1348 = vmatprep.subr.bf16.mxu0 %v1515_v2 }
  0x80   : > { %1387 = vmatpush3.bf16.msra.mxu1 %v1522_v11 }
  0x81   : > { %1388 = vmatprep.subr.bf16.mxu1 %v1638_v43 }
  0x82   : > { %1349 = vmatpush3.bf16.msra.mxu0 %v1516_v3 }
  0x83   : > { %1398 = vmatprep.subr.bf16.mxu0 %v1638_v43 }
  0x84   : > { %1389 = vmatpush3.bf16.msra.mxu1 %v1523_v12 }
  0x85   : > { %857 = vmatmul.mubr.bf16.vlgmr.msra.gmra.mxu0 %v336_v6  ;;  %1390 = vmatprep.subr.bf16.mxu1 %v1638_v43 }
  0x86   : > { %1406 = vmatprep.mubr.msk.bf16.mxu0 %vm1639_vm0, %v1638_v43  ;;  %1399 = vmatpush3.bf16.msra.mxu0 %v1526_v15 }
  0x87   : > { %1400 = vmatprep.subr.bf16.mxu0 %v1638_v43 }
  0x88   : > { %1391 = vmatpush3.bf16.msra.mxu1 %v1524_v13 }
  0x89   : > { %1392 = vmatprep.subr.bf16.mxu1 %v1638_v43 }
  0x8a   : > { %1401 = vmatpush3.bf16.msra.mxu0 %v1527_v51 }
  0x8b   : > { %1402 = vmatprep.subr.bf16.mxu0 %v1638_v43 }
  0x8c   : > { %1393 = vmatpush3.bf16.msra.mxu1 %v1525_v14 }
  0x8e   : > { %1403 = vmatpush3.bf16.msra.mxu0 %v1528_v52 }
  0x8f   : > { %1404 = vmatprep.subr.bf16.mxu0 %v1638_v43  ;;  %v1282_v43 = vld [vmem:[%s1901_s6] ss:$0 sm:$0xff] }
  0x92   : > { %1405 = vmatpush3.bf16.msra.mxu0 %v1529_v53 }
 0x125   : > { %v1306_v19 = vpop.f32.mrf.mxu0 }
 0x127   : > { %v1328_v16 = vpop.f32.mrf.mxu1  ;;  %v1307_v21 = vpop.f32.mrf.mxu0 }
 0x128   : > { %v1308_v27 = vadd.f32 %v1307_v21, %v1306_v19 }
 0x129   : > { %v1329_v17 = vpop.f32.mrf.mxu1  ;;  %v1309_v24 = vpop.f32.mrf.mxu0 }
 0x12a   : > { %v777_v30 = vadd.f32 %v1308_v27, %v1222_v28  ;;  %v1330_v31 = vadd.f32 %v1329_v17, %v1328_v16 }
 0x12b   : > { %v1331_v18 = vpop.f32.mrf.mxu1  ;;  %v1310_v29 = vpop.f32.mrf.mxu0 }
 0x12c   : > { %v1311_v32 = vadd.f32 %v1310_v29, %v1309_v24  ;;  %v818_v35 = vadd.f32 %v1330_v31, %v777_v30 }
 0x12d   : > { %v1332_v20 = vpop.f32.mrf.mxu1 }
 0x12e   : > { %v780_v36 = vadd.f32 %v1311_v32, %v1222_v28  ;;  %v1333_v37 = vadd.f32 %v1332_v20, %v1331_v18 }
 0x12f   : > { %v899_v22 = vpop.f32.mrf.mxu1 }
 0x130   : > { %v821_v42 = vadd.f32 %v1333_v37, %v780_v36 }
 0x131   : > { %v1376_v23 = vpop.f32.mrf.mxu1 }
 0x133   : > { %v902_v25 = vpop.f32.mrf.mxu1 }
 0x135   : > { %v1377_v26 = vpop.f32.mrf.mxu1 }
 0x145   : > { %v1350_v33 = vpop.f32.mrf.mxu0 }
 0x147   : > { %v1351_v34 = vpop.f32.mrf.mxu0 }
 0x148   : > { %v1352_v38 = vadd.f32 %v1351_v34, %v1350_v33 }
 0x149   : > { %v1353_v39 = vpop.f32.mrf.mxu0 }
 0x14a   : > { %v859_v40 = vadd.f32 %v1352_v38, %v818_v35 }
 0x14b   : > { %v1354_v41 = vpop.f32.mrf.mxu0 }
 0x14c   : > { %v1355_v44 = vadd.f32 %v1354_v41, %v1353_v39  ;;  %v900_v45 = vadd.f32 %v899_v22, %v859_v40 }
 0x14e   : > { %v862_v46 = vadd.f32 %v1355_v44, %v821_v42  ;;  %v906_v48 = vmax.f32 %v900_v45, 0.0 }
 0x150   : > { %v903_v47 = vadd.f32 %v902_v25, %v862_v46 }
 0x152   : > { %v907_v49 = vmax.f32 %v903_v47, 0.0 }
 0x154   : > { %v908_v50 = vpack.c.bf16 %v907_v49, %v906_v48 }
 0x156   : > { %1395 = vmatmul.mubr.bf16.vlgmr.msra.gmra.mxu1 %v908_v50 }
 0x216   : > { %v1014_v55 = vpop.f32.mrf.mxu1 }
 0x217   : > { %v1015_v57 = vadd.f32 %v1273_v54, %v1014_v55 }
 0x218   : > { %v1396_v56 = vpop.f32.mrf.mxu1 }
 0x219   : > { %v1021_v61 = vmax.f32 %v1015_v57, 0.0 }
 0x21a   : > { %v1017_v58 = vpop.f32.mrf.mxu1 }
 0x21b   : > { %v1018_v59 = vadd.f32 %v1273_v54, %v1017_v58 }
 0x21c   : > { %v1397_v60 = vpop.f32.mrf.mxu1 }
 0x21d   : > { %v1022_v62 = vmax.f32 %v1018_v59, 0.0 }
 0x21f   : > { %v1023_v63 = vpack.c.bf16 %v1022_v62, %v1021_v61 }
 0x221   : > { %1407 = vmatmul.mubr.msk.bf16.vlgmr.msra.gmra.mxu0 %vm1063_vm2, %v1023_v63 }
 0x2e1   : > { %v1101_v0 = vpop.f32.mrf.mxu0 }
 0x2e2   : > { %v1102_v1 = vadd.f32 %v1282_v43, %v1101_v0 }
 0x2e3   : > { %v1408_v2 = vpop.f32.mrf.mxu0 }
 0x2e4   : > { %v1109_v3 = vsel %vm1108_vm3, %v1102_v1, -inf }
 0x2e5   : > { %1110 = vmax.xlane.f32.xlu0 %v1109_v3  ;;  %v1104_v4 = vpop.f32.mrf.mxu0 }
 0x2e6   : > { %v1105_v5 = vadd.f32 %v1282_v43, %v1104_v4 }
 0x2e7   : > { %v1409_v6 = vpop.f32.mrf.mxu0 }
 0x2e8   : > { %v1112_v7 = vsel %vm1108_vm3, %v1105_v5, -inf }
 0x2e9   : > { %1113 = vmax.xlane.f32.xlu0 %v1112_v7 }
 0x36e   : > { %v1111_v8 = vpop.xlane.xlu0 %1110 }
 0x36f   : > { %v1115_v9 = vsub.f32 %v1102_v1, %v1111_v8 }
 0x371   : > { %v1117_v10 = vmul.f32 1.442695, %v1115_v9 }
 0x372   : > { %v1114_v11 = vpop.xlane.xlu0 %1113 }
 0x373   : > { %1530 = vpow2.f32 %v1117_v10  ;;  %v1116_v12 = vsub.f32 %v1105_v5, %v1114_v11 }
 0x375   : > { %v1119_v13 = vmul.f32 1.442695, %v1116_v12 }
 0x377   : > { %1532 = vpow2.f32 %v1119_v13 }
 0x380   : > { %v1531_v14 = vpop.eup %1530 }
 0x381   : > { %v1121_v15 = vsel %vm1108_vm3, %v1531_v14, 0.0 }
 0x382   : > { %1122 = vadd.xlane.f32.xlu1 %v1121_v15 }
 0x384   : > { %v1533_v16 = vpop.eup %1532 }
 0x385   : > { %v1124_v17 = vsel %vm1108_vm3, %v1533_v16, 0.0 }
 0x386   : > { %1125 = vadd.xlane.f32.xlu1 %v1124_v17 }
 0x40b   : > { %v1123_v18 = vpop.xlane.xlu1 %1122 }
 0x40c   : > { %1534 = vrcp.f32 %v1123_v18 }
 0x40f   : > { %v1126_v19 = vpop.xlane.xlu1 %1125 }
 0x410   : > { %1536 = vrcp.f32 %v1126_v19 }
 0x419   : > { %v1535_v20 = vpop.eup %1534 }
 0x41a   : > { %v1128_v21 = vmul.f32 %v1535_v20, %v1531_v14 }
 0x41c   : > { %1131 = vst.msk [vmem:[%s315_s29] sm:$0xff] %vm1108_vm3, %v1128_v21 }
 0x41d   : > { %v1537_v22 = vpop.eup %1536 }
 0x41e   : > { %v1130_v23 = vmul.f32 %v1537_v22, %v1533_v16 }
 0x420   : > { %1132 = vst.msk [vmem:[%s315_s29 + $0x8] sm:$0xff] %vm1108_vm3, %v1130_v23 }
 0x421 PF: > { %p18_p11 = scmp.ge.s32.totalorder %s1727_s12, 5   ;;  %s1915_s24 = smov %s1622_s25 }
 0x422   : > { %s1916_s25 = smov %s1626_s26  ;;  %s1917_s26 = smov %s1744_s20 }
 0x423   : > { %s1918_s27 = smov %s1727_s12  ;;  %20 = sbr.rel (!%p18_p11) target bundleno = 4 (0x4), region = 92 }
 0x428   :  { %1155 = vsyncpa [#allocation3], 1 }
 0x429   :  { %1157 = vsyncpa [#allocation3 + $0x1], 1 }
 0x42a   :  { %1158 = vsyncpa [#allocation5], 1 }

</bundles_post_ra>
